<compile_context>
chip_gen: v7x
topology: tpu7x:2x2x1
jax: 0.10.0
libtpu: 0.0.40
codegen_flags: <defaults>
</compile_context>

<pallas_src>
import jax
import jax.numpy as jnp
from jax.experimental import pallas as pl
from jax.experimental.pallas import tpu as pltpu


def pos_embed_kernel(emb_ref, cls_ref, pos_ref, o_ref):
    """emb_ref: (bb, N, D); cls_ref: (1, D); pos_ref: (N+1, D); o_ref: (bb, N+1, D)."""
    bb = o_ref.shape[0]
    D = o_ref.shape[-1]
    pos = pos_ref[...]                                   # (N+1, D)

    # [CLS] row is identical for every batch element: one (1, D) VPU add,
    # broadcast-stored into row 0 of each batch row of the output tile.
    cls_row = cls_ref[...] + pos[:1, :]                  # (1, D)
    o_ref[:, :1, :] = jnp.broadcast_to(cls_row[None, :, :], (bb, 1, D))

    # Patch rows: pure elementwise add (VPU), written directly at row offset 1.
    o_ref[:, 1:, :] = emb_ref[...] + pos[1:, :][None, :, :]

    # TODO(synk): dropout(p=0.1) only applies in train mode; eval semantics here.


def position_embedding(embeddings, cls_token, position_embeddings, *, rows_per_block=None):
    """PositionEmbedding.forward. embeddings: (B, N, D) -> (B, N+1, D)."""
    B, N, D = embeddings.shape
    S = N + 1
    assert cls_token.shape == (1, 1, D)
    assert position_embeddings.shape == (1, S, D)

    # Layout glue only: drop leading singleton dims so params are 2-D (rows, D)
    # with D on the lane axis.
    cls2d = cls_token.reshape(1, D)
    pos2d = position_embeddings.reshape(S, D)

    itemsize = jnp.dtype(embeddings.dtype).itemsize

    # Largest divisor of B whose (input tile + output tile) stays within a
    # per-step VMEM budget — bigger tiles => better HBM-roofline fraction for
    # this memory-bound op, fewer grid steps.
    if rows_per_block is None:
        budget = 2 * 1024 * 1024                      # bytes per in+out tile pair
        per_row = (N * D + S * D) * itemsize
        rows_per_block = 1
        for bb in range(1, B + 1):
            if B % bb == 0 and bb * per_row <= budget:
                rows_per_block = bb
    bb = rows_per_block
    assert B % bb == 0
    grid = (B // bb,)

    # Explicit scoped-VMEM budget: double-buffered in/out tiles + resident params,
    # with headroom; clamped to stay valid on v7x (64 MiB physical / TC).
    tile_bytes = bb * (N * D + S * D) * itemsize
    param_bytes = (S + 1) * D * itemsize
    vmem_limit = int(min(64 << 20, max(16 << 20, 4 * (2 * tile_bytes + 2 * param_bytes))))

    return pl.pallas_call(
        pos_embed_kernel,
        out_shape=jax.ShapeDtypeStruct((B, S, D), embeddings.dtype),
        grid_spec=pltpu.PrefetchScalarGridSpec(
            num_scalar_prefetch=0,
            grid=grid,
            in_specs=[
                pl.BlockSpec((bb, N, D), lambda i: (i, 0, 0)),   # patch embeddings
                pl.BlockSpec((1, D), lambda i: (0, 0)),          # cls token (resident)
                pl.BlockSpec((S, D), lambda i: (0, 0)),          # position table (resident)
            ],
            out_specs=pl.BlockSpec((bb, S, D), lambda i: (i, 0, 0)),
        ),
        compiler_params=pltpu.CompilerParams(
            dimension_semantics=("parallel",),
            vmem_limit_bytes=vmem_limit,
        ),
    )(embeddings, cls2d, pos2d)


# ---------------------------- pure-JAX reference -----------------------------
def _ref_position_embedding(embeddings, cls_token, position_embeddings):
    B, _, D = embeddings.shape
    cls = jnp.broadcast_to(cls_token, (B, 1, D))
    return jnp.concatenate([cls, embeddings], axis=1) + position_embeddings


if __name__ == "__main__":
    NUM_PATCHES, HIDDEN, BATCH = 8, 32, 2

    root = jax.random.PRNGKey(0)
    k_emb, k_cls, k_pos = jax.random.split(root, 3)
    embeddings = jax.random.normal(k_emb, (BATCH, NUM_PATCHES, HIDDEN), dtype=jnp.float32)
    cls_token = jax.random.normal(k_cls, (1, 1, HIDDEN), dtype=jnp.float32)
    position_embeddings = jax.random.normal(
        k_pos, (1, NUM_PATCHES + 1, HIDDEN), dtype=jnp.float32)

    out = jax.block_until_ready(
        position_embedding(embeddings, cls_token, position_embeddings))
    ref = jax.block_until_ready(
        _ref_position_embedding(embeddings, cls_token, position_embeddings))

    assert out.shape == (BATCH, NUM_PATCHES + 1, HIDDEN)
    if not bool(jnp.allclose(out, ref, atol=1e-6, rtol=1e-6)):
        raise AssertionError("Pallas output does not match JAX reference")

    print("KERNEL_OK")
</pallas_src>

<mosaic_0001>
module attributes {stable_mosaic.version = 11 : i64} {
  func.func @pos_embed_kernel(%arg0: i32, %arg1: memref<2x8x32xf32, #tpu.memory_space<vmem>>, %arg2: memref<1x32xf32, #tpu.memory_space<vmem>>, %arg3: memref<9x32xf32, #tpu.memory_space<vmem>>, %arg4: memref<2x9x32xf32, #tpu.memory_space<vmem>>) attributes {dimension_semantics = [#tpu.dimension_semantics<parallel>], iteration_bounds = array<i64: 1>, scalar_prefetch = 0 : i64, scratch_operands = 0 : i64, tpu.core_type = #tpu.core_type<tc>, window_params = [{transform_indices = @transform_0, window_bounds = array<i64: 2, 8, 32>}, {pipeline_mode = #tpu.pipeline_mode<synchronous>, transform_indices = @transform_1, window_bounds = array<i64: 1, 32>}, {pipeline_mode = #tpu.pipeline_mode<synchronous>, transform_indices = @transform_2, window_bounds = array<i64: 9, 32>}, {transform_indices = @transform_3, window_bounds = array<i64: 2, 9, 32>}]} {
    %c0 = arith.constant 0 : index
    %c0_0 = arith.constant 0 : index
    %0 = vector.load %arg3[%c0, %c0_0] : memref<9x32xf32, #tpu.memory_space<vmem>>, vector<9x32xf32>
    %c0_1 = arith.constant 0 : index
    %c0_2 = arith.constant 0 : index
    %1 = vector.load %arg2[%c0_1, %c0_2] : memref<1x32xf32, #tpu.memory_space<vmem>>, vector<1x32xf32>
    %2 = vector.extract_strided_slice %0 {offsets = [0, 0], sizes = [1, 32], strides = [1, 1]} : vector<9x32xf32> to vector<1x32xf32>
    %3 = arith.addf %1, %2 : vector<1x32xf32>
    %4 = vector.shape_cast %3 : vector<1x32xf32> to vector<1x1x32xf32>
    %5 = vector.shape_cast %4 : vector<1x1x32xf32> to vector<1x1x32xf32>
    %6 = vector.broadcast %5 : vector<1x1x32xf32> to vector<2x1x32xf32>
    %c0_3 = arith.constant 0 : index
    %c0_4 = arith.constant 0 : index
    %c0_5 = arith.constant 0 : index
    %7 = vector.load %arg4[%c0_3, %c0_4, %c0_5] : memref<2x9x32xf32, #tpu.memory_space<vmem>>, vector<2x1x32xf32>
    tpu.vector_store %arg4[%c0_3, %c0_4, %c0_5], %6 {strides = array<i32>} : memref<2x9x32xf32, #tpu.memory_space<vmem>>, vector<2x1x32xf32>,
    %c0_6 = arith.constant 0 : index
    %c0_7 = arith.constant 0 : index
    %c0_8 = arith.constant 0 : index
    %8 = vector.load %arg1[%c0_6, %c0_7, %c0_8] : memref<2x8x32xf32, #tpu.memory_space<vmem>>, vector<2x8x32xf32>
    %9 = vector.extract_strided_slice %0 {offsets = [1, 0], sizes = [8, 32], strides = [1, 1]} : vector<9x32xf32> to vector<8x32xf32>
    %10 = vector.shape_cast %9 : vector<8x32xf32> to vector<1x8x32xf32>
    %11 = vector.broadcast %10 : vector<1x8x32xf32> to vector<2x8x32xf32>
    %12 = arith.addf %8, %11 : vector<2x8x32xf32>
    %c0_9 = arith.constant 0 : index
    %c1 = arith.constant 1 : index
    %c0_10 = arith.constant 0 : index
    %13 = vector.load %arg4[%c0_9, %c1, %c0_10] : memref<2x9x32xf32, #tpu.memory_space<vmem>>, vector<2x8x32xf32>
    tpu.vector_store %arg4[%c0_9, %c1, %c0_10], %12 {strides = array<i32>} : memref<2x9x32xf32, #tpu.memory_space<vmem>>, vector<2x8x32xf32>,
    return
  }
  func.func @transform_0(%arg0: i32) -> (i32, i32, i32) {
    %c0_i32 = arith.constant 0 : i32
    %c0_i32_0 = arith.constant 0 : i32
    %c0_i32_1 = arith.constant 0 : i32
    return %arg0, %c0_i32, %c0_i32_0 : i32, i32, i32
  }
  func.func @transform_1(%arg0: i32) -> (i32, i32) {
    %c0_i32 = arith.constant 0 : i32
    %c0_i32_0 = arith.constant 0 : i32
    %c0_i32_1 = arith.constant 0 : i32
    return %c0_i32, %c0_i32_0 : i32, i32
  }
  func.func @transform_2(%arg0: i32) -> (i32, i32) {
    %c0_i32 = arith.constant 0 : i32
    %c0_i32_0 = arith.constant 0 : i32
    %c0_i32_1 = arith.constant 0 : i32
    return %c0_i32, %c0_i32_0 : i32, i32
  }
  func.func @transform_3(%arg0: i32) -> (i32, i32, i32) {
    %c0_i32 = arith.constant 0 : i32
    %c0_i32_0 = arith.constant 0 : i32
    %c0_i32_1 = arith.constant 0 : i32
    return %arg0, %c0_i32, %c0_i32_0 : i32, i32, i32
  }
}

</mosaic_0001>

<bundles_post_ra>
// kernel: tpu_custom_call.1
= control target key start
LH: loop header
LB: loop body
LE: loop exit
PB: predicated region body
PF: predicated region fallthrough
CT: control target
= control target key end

     0   :  { %8 = vsyncpa [#allocation3], 0  ;;  %s184_s0 = inlined_call_operand.hbm [shape: f32[2,8,32], index: 0, kind: input, shape index: {}]   ;;  %s185_s1 = inlined_call_operand.vmem [shape: f32[1,32], index: 1, kind: input, shape index: {}]   ;;  %s186_s2 = inlined_call_operand.hbm [shape: f32[9,32], index: 2, kind: input, shape index: {}]   ;;  %s187_s3 = inlined_call_operand.vmem [shape: f32[2,9,32], index: 3, kind: output, shape index: {}]  }
   0x1   :  { %9 = vsyncpa [#allocation5], 0  ;;  %s121_s12 = smov [#allocation2]   ;;  %s73_s16 = scalar_lea.hbm %s184_s0, 256 }
   0x2   :  { %s15_s13 = sshll.u32 %s121_s12, 4  ;;  %p74_p0 = scmp.ne.s32.totalorder %s184_s0, %s73_s16  ;;  %s16_s13 = int_to_ptr.vmem [resolvable:$true] %s15_s13 }
   0x3   :  { %p77_p1 = scmp.lt.u32.totalorder %s73_s16, %s184_s0 }
   0x5   :  { %p79_p2 = pnand %p77_p1, %p74_p0 }
   0x7   :  { %82 = shalt.err (!%p79_p2)
}
   0x8   :  { %s83_s21 = scalar_lea.vmem %s16_s13, 256  ;;  %p88_p4 = scmp.lt.s32.totalorder %s16_s13, %s16_s13 }
   0x9   :  { %p84_p3 = scmp.ne.s32.totalorder %s16_s13, %s83_s21  ;;  %p89_p5 = scmp.lt.s32.totalorder %s83_s21, %s83_s21 }
   0xb   :  { %p90_p6 = por %p89_p5, %p88_p4 }
   0xd   :  { %p91_p7 = pnand %p90_p6, %p84_p3 }
   0xf   :  { %94 = shalt.err (!%p91_p7)
}
  0x10   :  { %s122_s22 = smov 128   ;;  %s123_s23 = smov 8  }
  0x11   :  { %21 = dma.hbm_to_vmem [thread:$0]  %s184_s0, 256, %s16_s13, [#allocation3], %s122_s22, %s122_s22, %s123_s23  }
  0x12   :  { %s124_s26 = smov [#allocation4]   ;;  %s95_s30 = scalar_lea.hbm %s186_s2, 256 }
  0x13   :  { %s29_s27 = sshll.u32 %s124_s26, 4  ;;  %p96_p8 = scmp.ne.s32.totalorder %s186_s2, %s95_s30  ;;  %s30_s27 = int_to_ptr.vmem [resolvable:$true] %s29_s27 }
  0x14   :  { %p99_p9 = scmp.lt.u32.totalorder %s95_s30, %s186_s2 }
  0x16   :  { %p101_p10 = pnand %p99_p9, %p96_p8 }
  0x18   :  { %104 = shalt.err (!%p101_p10)
}
  0x19   :  { %s105_s8 = scalar_lea.vmem %s30_s27, 256  ;;  %p110_p12 = scmp.lt.s32.totalorder %s30_s27, %s30_s27 }
  0x1a   :  { %p106_p11 = scmp.ne.s32.totalorder %s30_s27, %s105_s8  ;;  %p111_p13 = scmp.lt.s32.totalorder %s105_s8, %s105_s8 }
  0x1c   :  { %p112_p0 = por %p111_p13, %p110_p12 }
  0x1e   :  { %p113_p1 = pnand %p112_p0, %p106_p11 }
  0x20   :  { %116 = shalt.err (!%p113_p1)
}
  0x21   :  { %35 = dma.hbm_to_vmem [thread:$0]  %s186_s2, 256, %s30_s27, [#allocation5], %s122_s22, %s122_s22, %s123_s23  }
  0x22   :  { %117 = dma.done.wait [#allocation3], 256  }
  0x23   :  { %118 = vsyncadd [#allocation3], 4294967040 }
  0x24   :  { %119 = dma.done.wait [#allocation5], 256  }
  0x25   :  { %120 = vsyncadd [#allocation5], 4294967040  ;;  %vm46_vm0 = vcmask 253952   ;;  %v42_v0 = vld [vmem:[#allocation4] sm:$0xff]  ;;  %v44_v1 = vld [vmem:[%s185_s1] sm:$0x1] }
  0x26   :  { %v43_v2 = vld [vmem:[#allocation4 + $0x8] sm:$0x1]  ;;  %vm53_vm1 = vcmask 1046528   ;;  %v45_v3 = vadd.f32 %v44_v1, %v42_v0  ;;  %v54_v4 = vrot.slane %v42_v0, 1  ;;  %v49_v5 = vld [vmem:[#allocation2] sm:$0xff]  ;;  %v50_v7 = vld [vmem:[#allocation2 + $0x8] sm:$0xff] }
  0x27   :  { %v55_v6 = vrot.slane %v43_v2, 1  ;;  %vm60_vm2 = vcmask 261120  }
  0x28   :  { %47 = vst.msk [vmem:[%s187_s3] sm:$0x1] %vm46_vm0, %v45_v3  ;;  %48 = vst.msk [vmem:[%s187_s3 + $0x10] sm:$0x1] %vm46_vm0, %v45_v3 }
  0x29   :  { %v56_v8 = vsel %vm53_vm1, %v54_v4, %v55_v6 }
  0x2a   :  { %v58_v9 = vadd.f32 %v56_v8, %v49_v5  ;;  %v59_v10 = vadd.f32 %v56_v8, %v50_v7 }
  0x2c   :  { %61 = vst.msk [vmem:[%s187_s3 + $0x1] sm:$0xff] %vm60_vm2, %v58_v9  ;;  %62 = vst.msk [vmem:[%s187_s3 + $0x11] sm:$0xff] %vm60_vm2, %v59_v10 }
  0x2d   :  { %67 = vsyncpa [#allocation3], 1 }
  0x2e   :  { %68 = vsyncpa [#allocation5], 1 }

</bundles_post_ra>
